<compile_context>
chip_gen: v7x
topology: tpu7x:2x2x1
jax: 0.10.0
libtpu: 0.0.40
codegen_flags: <defaults>
</compile_context>

<pallas_src>
import numpy as np
import jax
import jax.numpy as jnp
from jax.experimental import pallas as pl
from jax.experimental.pallas import tpu as pltpu

# The kernel consumes x in (B, L, C) layout -- exactly what the PyTorch module
# receives (batch, window_size, input_dim); the module's permute(0, 2, 1) to
# NCL is folded into the host-side parameter packing.
#
# Structural changes vs. the previous version (per perf review):
#   * batch grid  grid=(B // TB,)  with dimension_semantics=("parallel",) so
#     both v7x TensorCores take half the batch and x tiles are pipelined; the
#     packed-parameter BlockSpec returns a constant block index so the weights
#     stay resident in VMEM across grid steps (one weight DMA total).
#   * each conv layer is a sum of K per-tap (batched) matmuls -- no im2col
#     concat to a non-128 lane width and no non-(8,128)-aligned reshape, so no
#     VMEM relayout copies.
#   * ALL parameters are merged into ONE packed (P_ROWS, C2) buffer
#     (2 input DMAs per launch instead of 3).
#   * MaxPool1d + fc are fused into relayout-free per-pair sublane maxes and a
#     VPU multiply-accumulate (no 4-D reshape through the XLU).
#   * the kernel output is lane-dense: batch lives on the lane axis of a
#     (B//TB, 1, TB) buffer; the wrapper reshapes it to the module's (B, 1).
#   * elementwise math stays f32 (v5e VPU/EUP have no bf16).
#     TODO(synk): on v6e/v7x, bf16 conv operands (preferred_element_type=f32)
#     would halve HBM/VMEM traffic once this is scaled up.
#   * VMEM footprint per step is ~100 KB (x tile + resident params), far under
#     the v7x 32 MiB scoped / 64 MiB physical budget; raise TB before scaling.

# ---------------- configuration (small, consistent with the module) ----------
B = 8                    # batch
TB = 4                   # batch tile per grid step (B % TB == 0)
INPUT_DIM = 4            # input_dim
WINDOW = 16              # window_size
LAYER_DIMS = (8, 16)     # layer_dims
K = 3                    # conv_kernel_size
POOL = 2                 # max_pool_kernel_size
NUM_CLASSES = 1

C0 = INPUT_DIM
C1, C2 = LAYER_DIMS
L0 = WINDOW
L1 = L0 - K + 1          # after conv1 (valid conv)
L2 = L1 - K + 1          # after conv2 (valid conv)
LP = L2 // POOL          # after MaxPool1d(kernel=POOL, stride=POOL)
FLAT = C2 * LP           # flatten size fed to fc
NBLK = B // TB           # grid size along batch

# Packed-parameter row offsets (single buffer, lane width C2):
#   rows [0, K*C0)            conv1 per-tap (C0, C1) slabs (zero-padded lanes)
#   row  R_B1                 conv1 bias (first C1 lanes)
#   rows [R_W2, R_W2 + K*C1)  conv2 per-tap (C1, C2) slabs
#   row  R_B2                 conv2 bias
#   rows [R_WFC, R_WFC + LP)  fc weight in (l, c) order
#   row  R_BFC                fc bias (lane 0)
R_B1 = K * C0
R_W2 = R_B1 + 1
R_B2 = R_W2 + K * C1
R_WFC = R_B2 + 1
R_BFC = R_WFC + LP
P_ROWS = R_BFC + 1


def cnn1d_kernel(x_ref, p_ref, out_ref):
    x = x_ref[...]                                            # (TB, L0, C0)

    # Conv1 + bias + ReLU: sum of K per-tap batched matmuls (no im2col
    # concat / non-tile-aligned reshape -> no relayout copies).
    h1 = jnp.zeros((TB, L1, C1), jnp.float32)
    for k in range(K):
        wk = jnp.broadcast_to(p_ref[k * C0:(k + 1) * C0, 0:C1], (TB, C0, C1))
        h1 = h1 + jnp.einsum('blc,bcd->bld', x[:, k:k + L1, :], wk,
                             preferred_element_type=jnp.float32)
    h1 = jnp.maximum(h1 + p_ref[R_B1:R_B1 + 1, 0:C1], 0.0)    # (TB, L1, C1)
    # TODO(synk): Dropout1d(p) is identity in eval mode; inference semantics only.

    # Conv2 + bias + ReLU: same per-tap pattern.
    h2 = jnp.zeros((TB, L2, C2), jnp.float32)
    for k in range(K):
        wk = jnp.broadcast_to(p_ref[R_W2 + k * C1:R_W2 + (k + 1) * C1, :],
                              (TB, C1, C2))
        h2 = h2 + jnp.einsum('blc,bcd->bld', h1[:, k:k + L2, :], wk,
                             preferred_element_type=jnp.float32)
    h2 = jnp.maximum(h2 + p_ref[R_B2:R_B2 + 1, :], 0.0)       # (TB, L2, C2)

    # MaxPool1d(POOL) fused with fc (NUM_CLASSES == 1): per-pair sublane max
    # + VPU multiply-accumulate against the (l, c)-ordered fc weight. No 4-D
    # reshape relayout and no (1, FLAT) @ (FLAT, 1) degenerate MXU dot.
    acc = jnp.zeros((TB, 1, C2), jnp.float32)
    for l in range(LP):
        pooled_l = jnp.maximum(h2[:, POOL * l:POOL * l + 1, :],
                               h2[:, POOL * l + 1:POOL * l + 2, :])   # (TB, 1, C2)
        acc = acc + pooled_l * p_ref[R_WFC + l:R_WFC + l + 1, :]
    logits = jnp.sum(jnp.sum(acc, axis=2), axis=1)                    # (TB,)
    bfc = p_ref[R_BFC:R_BFC + 1, 0:1]                                 # (1, 1)
    # Lane-dense store: batch sits on the lane axis of the output block.
    out_ref[...] = jax.nn.sigmoid(logits.reshape(1, 1, TB) + bfc.reshape(1, 1, 1))


@jax.jit
def variable_cnn1d_forward(x, params):
    out = pl.pallas_call(
        cnn1d_kernel,
        out_shape=jax.ShapeDtypeStruct((NBLK, 1, TB), jnp.float32),
        grid_spec=pltpu.PrefetchScalarGridSpec(
            num_scalar_prefetch=0,
            grid=(NBLK,),
            in_specs=[
                pl.BlockSpec((TB, L0, C0), lambda b: (b, 0, 0)),   # x tile per step
                pl.BlockSpec((P_ROWS, C2), lambda b: (0, 0)),      # weights resident
            ],
            out_specs=pl.BlockSpec((1, 1, TB), lambda b: (b, 0, 0)),
        ),
        compiler_params=pltpu.CompilerParams(
            dimension_semantics=("parallel",)),
    )(x, params)
    # (NBLK, 1, TB) flattens row-major in batch order; match the module's (B, 1).
    return out.reshape(B, NUM_CLASSES)


def pack_params(w1_t, b1v, w2_t, b2v, wfc_t, bfcv):
    """PyTorch-layout params -> one packed kernel buffer (single weight DMA)."""
    # Conv per-tap slabs: row index k*Cin + ci, col co  <-  torch (co, ci, k).
    w1_p = jnp.transpose(w1_t, (2, 1, 0)).reshape(K * C0, C1)
    w2_p = jnp.transpose(w2_t, (2, 1, 0)).reshape(K * C1, C2)
    w1_pad = jnp.zeros((K * C0, C2), jnp.float32).at[:, :C1].set(w1_p)
    b1_row = jnp.zeros((1, C2), jnp.float32).at[0, :C1].set(b1v)
    b2_row = b2v[None, :].astype(jnp.float32)
    # fc weight: torch flatten index is c*LP + l; the kernel consumes (l, c).
    wfc2d = jnp.transpose(wfc_t.reshape(NUM_CLASSES, C2, LP)[0], (1, 0))    # (LP, C2)
    bfc_row = jnp.zeros((1, C2), jnp.float32).at[0, 0].set(bfcv[0])
    return jnp.concatenate([w1_pad, b1_row, w2_p, b2_row, wfc2d, bfc_row],
                           axis=0).astype(jnp.float32)                      # (P_ROWS, C2)


def _ref_forward(x, w1_t, b1v, w2_t, b2v, wfc_t, bfcv):
    """Pure-JAX mirror of the PyTorch forward (NCL layout, torch weight layouts)."""
    out = jnp.transpose(x, (0, 2, 1))                                  # (B, C, L)
    dn = ('NCH', 'OIH', 'NCH')
    out = jax.lax.conv_general_dilated(out, w1_t, (1,), 'VALID',
                                       dimension_numbers=dn) + b1v[None, :, None]
    out = jnp.maximum(out, 0.0)
    out = jax.lax.conv_general_dilated(out, w2_t, (1,), 'VALID',
                                       dimension_numbers=dn) + b2v[None, :, None]
    out = jnp.maximum(out, 0.0)
    out = jnp.max(out[:, :, :LP * POOL].reshape(B, C2, LP, POOL), axis=-1)
    out = out.reshape(B, -1)                                           # (c, l) flatten order
    out = out @ wfc_t.T + bfcv[None, :]
    return jax.nn.sigmoid(out)


if __name__ == "__main__":
    assert NUM_CLASSES == 1     # fc implemented as multiply+reduce for a single class
    assert B % TB == 0

    key = jax.random.PRNGKey(0)
    ks = jax.random.split(key, 8)
    x = jax.random.normal(ks[0], (B, WINDOW, INPUT_DIM), jnp.float32)

    # Deterministic PyTorch-layout parameters (Conv1d: (Cout, Cin, K); Linear: (out, in)).
    w1_t = jax.random.normal(ks[1], (C1, C0, K), jnp.float32) * 0.1
    b1v = jax.random.normal(ks[2], (C1,), jnp.float32) * 0.1
    w2_t = jax.random.normal(ks[3], (C2, C1, K), jnp.float32) * 0.1
    b2v = jax.random.normal(ks[4], (C2,), jnp.float32) * 0.1
    wfc_t = jax.random.normal(ks[5], (NUM_CLASSES, FLAT), jnp.float32) * 0.1
    bfcv = jax.random.normal(ks[6], (NUM_CLASSES,), jnp.float32) * 0.1

    params = pack_params(w1_t, b1v, w2_t, b2v, wfc_t, bfcv)

    out = variable_cnn1d_forward(x, params)
    out = jax.block_until_ready(out)

    ref = _ref_forward(x, w1_t, b1v, w2_t, b2v, wfc_t, bfcv)
    np.testing.assert_allclose(np.asarray(out), np.asarray(ref), atol=1e-5, rtol=1e-5)
    print("KERNEL_OK")
</pallas_src>

<mosaic_0001>
module attributes {stable_mosaic.version = 11 : i64} {
  func.func @cnn1d_kernel(%arg0: i32, %arg1: memref<4x16x4xf32, #tpu.memory_space<vmem>>, %arg2: memref<45x16xf32, #tpu.memory_space<vmem>>, %arg3: memref<1x1x4xf32, #tpu.memory_space<vmem>>) attributes {dimension_semantics = [#tpu.dimension_semantics<parallel>], iteration_bounds = array<i64: 2>, scalar_prefetch = 0 : i64, scratch_operands = 0 : i64, tpu.core_type = #tpu.core_type<tc>, window_params = [{transform_indices = @transform_0, window_bounds = array<i64: 4, 16, 4>}, {pipeline_mode = #tpu.pipeline_mode<synchronous>, transform_indices = @transform_1, window_bounds = array<i64: 45, 16>}, {transform_indices = @transform_2, window_bounds = array<i64: 1, 1, 4>}]} {
    %c0 = arith.constant 0 : index
    %c0_0 = arith.constant 0 : index
    %c0_1 = arith.constant 0 : index
    %0 = vector.load %arg1[%c0, %c0_0, %c0_1] : memref<4x16x4xf32, #tpu.memory_space<vmem>>, vector<4x16x4xf32>
    %cst = arith.constant 0.000000e+00 : f32
    %1 = vector.broadcast %cst : f32 to vector<4x14x8xf32>
    %c0_2 = arith.constant 0 : index
    %c0_3 = arith.constant 0 : index
    %2 = vector.load %arg2[%c0_2, %c0_3] : memref<45x16xf32, #tpu.memory_space<vmem>>, vector<4x8xf32>
    %3 = vector.shape_cast %2 : vector<4x8xf32> to vector<1x4x8xf32>
    %4 = vector.broadcast %3 : vector<1x4x8xf32> to vector<4x4x8xf32>
    %5 = vector.extract_strided_slice %0 {offsets = [0, 0, 0], sizes = [4, 14, 4], strides = [1, 1, 1]} : vector<4x16x4xf32> to vector<4x14x4xf32>
    "tpu.trace_start"() <{level = 10 : i32, message = "blc,bcd->bld"}> : () -> ()
    %cst_4 = arith.constant dense<0.000000e+00> : vector<4x14x8xf32>
    %6 = tpu.matmul %5, %4, %cst_4 {dimension_numbers = #tpu.dot_dimension_numbers<[2], [1], [1], [2], [0, 0, 0, 1, 1, 2], [0], [0]>} : vector<4x14x4xf32>, vector<4x4x8xf32>, vector<4x14x8xf32> -> vector<4x14x8xf32>
    "tpu.trace_stop"() : () -> ()
    %7 = arith.addf %1, %6 : vector<4x14x8xf32>
    %c4 = arith.constant 4 : index
    %c0_5 = arith.constant 0 : index
    %8 = vector.load %arg2[%c4, %c0_5] : memref<45x16xf32, #tpu.memory_space<vmem>>, vector<4x8xf32>
    %9 = vector.shape_cast %8 : vector<4x8xf32> to vector<1x4x8xf32>
    %10 = vector.broadcast %9 : vector<1x4x8xf32> to vector<4x4x8xf32>
    %11 = vector.extract_strided_slice %0 {offsets = [0, 1, 0], sizes = [4, 14, 4], strides = [1, 1, 1]} : vector<4x16x4xf32> to vector<4x14x4xf32>
    "tpu.trace_start"() <{level = 10 : i32, message = "blc,bcd->bld"}> : () -> ()
    %cst_6 = arith.constant dense<0.000000e+00> : vector<4x14x8xf32>
    %12 = tpu.matmul %11, %10, %cst_6 {dimension_numbers = #tpu.dot_dimension_numbers<[2], [1], [1], [2], [0, 0, 0, 1, 1, 2], [0], [0]>} : vector<4x14x4xf32>, vector<4x4x8xf32>, vector<4x14x8xf32> -> vector<4x14x8xf32>
    "tpu.trace_stop"() : () -> ()
    %13 = arith.addf %7, %12 : vector<4x14x8xf32>
    %c8 = arith.constant 8 : index
    %c0_7 = arith.constant 0 : index
    %14 = vector.load %arg2[%c8, %c0_7] : memref<45x16xf32, #tpu.memory_space<vmem>>, vector<4x8xf32>
    %15 = vector.shape_cast %14 : vector<4x8xf32> to vector<1x4x8xf32>
    %16 = vector.broadcast %15 : vector<1x4x8xf32> to vector<4x4x8xf32>
    %17 = vector.extract_strided_slice %0 {offsets = [0, 2, 0], sizes = [4, 14, 4], strides = [1, 1, 1]} : vector<4x16x4xf32> to vector<4x14x4xf32>
    "tpu.trace_start"() <{level = 10 : i32, message = "blc,bcd->bld"}> : () -> ()
    %cst_8 = arith.constant dense<0.000000e+00> : vector<4x14x8xf32>
    %18 = tpu.matmul %17, %16, %cst_8 {dimension_numbers = #tpu.dot_dimension_numbers<[2], [1], [1], [2], [0, 0, 0, 1, 1, 2], [0], [0]>} : vector<4x14x4xf32>, vector<4x4x8xf32>, vector<4x14x8xf32> -> vector<4x14x8xf32>
    "tpu.trace_stop"() : () -> ()
    %19 = arith.addf %13, %18 : vector<4x14x8xf32>
    %c12 = arith.constant 12 : index
    %c0_9 = arith.constant 0 : index
    %20 = vector.load %arg2[%c12, %c0_9] : memref<45x16xf32, #tpu.memory_space<vmem>>, vector<1x8xf32>
    %21 = vector.shape_cast %20 : vector<1x8xf32> to vector<1x1x8xf32>
    %22 = vector.broadcast %21 : vector<1x1x8xf32> to vector<4x14x8xf32>
    %23 = arith.addf %19, %22 : vector<4x14x8xf32>
    %cst_10 = arith.constant 0.000000e+00 : f32
    %24 = vector.broadcast %cst_10 : f32 to vector<4x14x8xf32>
    %25 = arith.maximumf %23, %24 : vector<4x14x8xf32>
    %cst_11 = arith.constant 0.000000e+00 : f32
    %26 = vector.broadcast %cst_11 : f32 to vector<4x12x16xf32>
    %c13 = arith.constant 13 : index
    %c0_12 = arith.constant 0 : index
    %27 = vector.load %arg2[%c13, %c0_12] : memref<45x16xf32, #tpu.memory_space<vmem>>, vector<8x16xf32>
    %28 = vector.shape_cast %27 : vector<8x16xf32> to vector<1x8x16xf32>
    %29 = vector.broadcast %28 : vector<1x8x16xf32> to vector<4x8x16xf32>
    %30 = vector.extract_strided_slice %25 {offsets = [0, 0, 0], sizes = [4, 12, 8], strides = [1, 1, 1]} : vector<4x14x8xf32> to vector<4x12x8xf32>
    "tpu.trace_start"() <{level = 10 : i32, message = "blc,bcd->bld"}> : () -> ()
    %cst_13 = arith.constant dense<0.000000e+00> : vector<4x12x16xf32>
    %31 = tpu.matmul %30, %29, %cst_13 {dimension_numbers = #tpu.dot_dimension_numbers<[2], [1], [1], [2], [0, 0, 0, 1, 1, 2], [0], [0]>} : vector<4x12x8xf32>, vector<4x8x16xf32>, vector<4x12x16xf32> -> vector<4x12x16xf32>
    "tpu.trace_stop"() : () -> ()
    %32 = arith.addf %26, %31 : vector<4x12x16xf32>
    %c21 = arith.constant 21 : index
    %c0_14 = arith.constant 0 : index
    %33 = vector.load %arg2[%c21, %c0_14] : memref<45x16xf32, #tpu.memory_space<vmem>>, vector<8x16xf32>
    %34 = vector.shape_cast %33 : vector<8x16xf32> to vector<1x8x16xf32>
    %35 = vector.broadcast %34 : vector<1x8x16xf32> to vector<4x8x16xf32>
    %36 = vector.extract_strided_slice %25 {offsets = [0, 1, 0], sizes = [4, 12, 8], strides = [1, 1, 1]} : vector<4x14x8xf32> to vector<4x12x8xf32>
    "tpu.trace_start"() <{level = 10 : i32, message = "blc,bcd->bld"}> : () -> ()
    %cst_15 = arith.constant dense<0.000000e+00> : vector<4x12x16xf32>
    %37 = tpu.matmul %36, %35, %cst_15 {dimension_numbers = #tpu.dot_dimension_numbers<[2], [1], [1], [2], [0, 0, 0, 1, 1, 2], [0], [0]>} : vector<4x12x8xf32>, vector<4x8x16xf32>, vector<4x12x16xf32> -> vector<4x12x16xf32>
    "tpu.trace_stop"() : () -> ()
    %38 = arith.addf %32, %37 : vector<4x12x16xf32>
    %c29 = arith.constant 29 : index
    %c0_16 = arith.constant 0 : index
    %39 = vector.load %arg2[%c29, %c0_16] : memref<45x16xf32, #tpu.memory_space<vmem>>, vector<8x16xf32>
    %40 = vector.shape_cast %39 : vector<8x16xf32> to vector<1x8x16xf32>
    %41 = vector.broadcast %40 : vector<1x8x16xf32> to vector<4x8x16xf32>
    %42 = vector.extract_strided_slice %25 {offsets = [0, 2, 0], sizes = [4, 12, 8], strides = [1, 1, 1]} : vector<4x14x8xf32> to vector<4x12x8xf32>
    "tpu.trace_start"() <{level = 10 : i32, message = "blc,bcd->bld"}> : () -> ()
    %cst_17 = arith.constant dense<0.000000e+00> : vector<4x12x16xf32>
    %43 = tpu.matmul %42, %41, %cst_17 {dimension_numbers = #tpu.dot_dimension_numbers<[2], [1], [1], [2], [0, 0, 0, 1, 1, 2], [0], [0]>} : vector<4x12x8xf32>, vector<4x8x16xf32>, vector<4x12x16xf32> -> vector<4x12x16xf32>
    "tpu.trace_stop"() : () -> ()
    %44 = arith.addf %38, %43 : vector<4x12x16xf32>
    %c37 = arith.constant 37 : index
    %c0_18 = arith.constant 0 : index
    %45 = vector.load %arg2[%c37, %c0_18] : memref<45x16xf32, #tpu.memory_space<vmem>>, vector<1x16xf32>
    %46 = vector.shape_cast %45 : vector<1x16xf32> to vector<1x1x16xf32>
    %47 = vector.broadcast %46 : vector<1x1x16xf32> to vector<4x12x16xf32>
    %48 = arith.addf %44, %47 : vector<4x12x16xf32>
    %cst_19 = arith.constant 0.000000e+00 : f32
    %49 = vector.broadcast %cst_19 : f32 to vector<4x12x16xf32>
    %50 = arith.maximumf %48, %49 : vector<4x12x16xf32>
    %cst_20 = arith.constant 0.000000e+00 : f32
    %51 = vector.broadcast %cst_20 : f32 to vector<4x1x16xf32>
    %52 = vector.extract_strided_slice %50 {offsets = [0, 0, 0], sizes = [4, 1, 16], strides = [1, 1, 1]} : vector<4x12x16xf32> to vector<4x1x16xf32>
    %53 = vector.extract_strided_slice %50 {offsets = [0, 1, 0], sizes = [4, 1, 16], strides = [1, 1, 1]} : vector<4x12x16xf32> to vector<4x1x16xf32>
    %54 = arith.maximumf %52, %53 : vector<4x1x16xf32>
    %c38 = arith.constant 38 : index
    %c0_21 = arith.constant 0 : index
    %55 = vector.load %arg2[%c38, %c0_21] : memref<45x16xf32, #tpu.memory_space<vmem>>, vector<1x16xf32>
    %56 = vector.shape_cast %55 : vector<1x16xf32> to vector<1x1x16xf32>
    %57 = vector.broadcast %56 : vector<1x1x16xf32> to vector<4x1x16xf32>
    %58 = arith.mulf %54, %57 : vector<4x1x16xf32>
    %59 = arith.addf %51, %58 : vector<4x1x16xf32>
    %60 = vector.extract_strided_slice %50 {offsets = [0, 2, 0], sizes = [4, 1, 16], strides = [1, 1, 1]} : vector<4x12x16xf32> to vector<4x1x16xf32>
    %61 = vector.extract_strided_slice %50 {offsets = [0, 3, 0], sizes = [4, 1, 16], strides = [1, 1, 1]} : vector<4x12x16xf32> to vector<4x1x16xf32>
    %62 = arith.maximumf %60, %61 : vector<4x1x16xf32>
    %c39 = arith.constant 39 : index
    %c0_22 = arith.constant 0 : index
    %63 = vector.load %arg2[%c39, %c0_22] : memref<45x16xf32, #tpu.memory_space<vmem>>, vector<1x16xf32>
    %64 = vector.shape_cast %63 : vector<1x16xf32> to vector<1x1x16xf32>
    %65 = vector.broadcast %64 : vector<1x1x16xf32> to vector<4x1x16xf32>
    %66 = arith.mulf %62, %65 : vector<4x1x16xf32>
    %67 = arith.addf %59, %66 : vector<4x1x16xf32>
    %68 = vector.extract_strided_slice %50 {offsets = [0, 4, 0], sizes = [4, 1, 16], strides = [1, 1, 1]} : vector<4x12x16xf32> to vector<4x1x16xf32>
    %69 = vector.extract_strided_slice %50 {offsets = [0, 5, 0], sizes = [4, 1, 16], strides = [1, 1, 1]} : vector<4x12x16xf32> to vector<4x1x16xf32>
    %70 = arith.maximumf %68, %69 : vector<4x1x16xf32>
    %c40 = arith.constant 40 : index
    %c0_23 = arith.constant 0 : index
    %71 = vector.load %arg2[%c40, %c0_23] : memref<45x16xf32, #tpu.memory_space<vmem>>, vector<1x16xf32>
    %72 = vector.shape_cast %71 : vector<1x16xf32> to vector<1x1x16xf32>
    %73 = vector.broadcast %72 : vector<1x1x16xf32> to vector<4x1x16xf32>
    %74 = arith.mulf %70, %73 : vector<4x1x16xf32>
    %75 = arith.addf %67, %74 : vector<4x1x16xf32>
    %76 = vector.extract_strided_slice %50 {offsets = [0, 6, 0], sizes = [4, 1, 16], strides = [1, 1, 1]} : vector<4x12x16xf32> to vector<4x1x16xf32>
    %77 = vector.extract_strided_slice %50 {offsets = [0, 7, 0], sizes = [4, 1, 16], strides = [1, 1, 1]} : vector<4x12x16xf32> to vector<4x1x16xf32>
    %78 = arith.maximumf %76, %77 : vector<4x1x16xf32>
    %c41 = arith.constant 41 : index
    %c0_24 = arith.constant 0 : index
    %79 = vector.load %arg2[%c41, %c0_24] : memref<45x16xf32, #tpu.memory_space<vmem>>, vector<1x16xf32>
    %80 = vector.shape_cast %79 : vector<1x16xf32> to vector<1x1x16xf32>
    %81 = vector.broadcast %80 : vector<1x1x16xf32> to vector<4x1x16xf32>
    %82 = arith.mulf %78, %81 : vector<4x1x16xf32>
    %83 = arith.addf %75, %82 : vector<4x1x16xf32>
    %84 = vector.extract_strided_slice %50 {offsets = [0, 8, 0], sizes = [4, 1, 16], strides = [1, 1, 1]} : vector<4x12x16xf32> to vector<4x1x16xf32>
    %85 = vector.extract_strided_slice %50 {offsets = [0, 9, 0], sizes = [4, 1, 16], strides = [1, 1, 1]} : vector<4x12x16xf32> to vector<4x1x16xf32>
    %86 = arith.maximumf %84, %85 : vector<4x1x16xf32>
    %c42 = arith.constant 42 : index
    %c0_25 = arith.constant 0 : index
    %87 = vector.load %arg2[%c42, %c0_25] : memref<45x16xf32, #tpu.memory_space<vmem>>, vector<1x16xf32>
    %88 = vector.shape_cast %87 : vector<1x16xf32> to vector<1x1x16xf32>
    %89 = vector.broadcast %88 : vector<1x1x16xf32> to vector<4x1x16xf32>
    %90 = arith.mulf %86, %89 : vector<4x1x16xf32>
    %91 = arith.addf %83, %90 : vector<4x1x16xf32>
    %92 = vector.extract_strided_slice %50 {offsets = [0, 10, 0], sizes = [4, 1, 16], strides = [1, 1, 1]} : vector<4x12x16xf32> to vector<4x1x16xf32>
    %93 = vector.extract_strided_slice %50 {offsets = [0, 11, 0], sizes = [4, 1, 16], strides = [1, 1, 1]} : vector<4x12x16xf32> to vector<4x1x16xf32>
    %94 = arith.maximumf %92, %93 : vector<4x1x16xf32>
    %c43 = arith.constant 43 : index
    %c0_26 = arith.constant 0 : index
    %95 = vector.load %arg2[%c43, %c0_26] : memref<45x16xf32, #tpu.memory_space<vmem>>, vector<1x16xf32>
    %96 = vector.shape_cast %95 : vector<1x16xf32> to vector<1x1x16xf32>
    %97 = vector.broadcast %96 : vector<1x1x16xf32> to vector<4x1x16xf32>
    %98 = arith.mulf %94, %97 : vector<4x1x16xf32>
    %99 = arith.addf %91, %98 : vector<4x1x16xf32>
    %cst_27 = arith.constant dense<0.000000e+00> : vector<4x1xf32>
    %100 = vector.multi_reduction <add>, %99, %cst_27 [2] : vector<4x1x16xf32> to vector<4x1xf32>
    %cst_28 = arith.constant dense<0.000000e+00> : vector<4xf32>
    %101 = vector.multi_reduction <add>, %100, %cst_28 [1] : vector<4x1xf32> to vector<4xf32>
    %c44 = arith.constant 44 : index
    %c0_29 = arith.constant 0 : index
    %102 = vector.load %arg2[%c44, %c0_29] : memref<45x16xf32, #tpu.memory_space<vmem>>, vector<1x1xf32>
    %103 = vector.shape_cast %101 : vector<4xf32> to vector<1x1x4xf32>
    %104 = vector.shape_cast %102 : vector<1x1xf32> to vector<1x1x1xf32>
    %105 = vector.broadcast %104 : vector<1x1x1xf32> to vector<1x1x4xf32>
    %106 = arith.addf %103, %105 : vector<1x1x4xf32>
    %107 = arith.negf %106 : vector<1x1x4xf32>
    %108 = math.exp %107 : vector<1x1x4xf32>
    %cst_30 = arith.constant 1.000000e+00 : f32
    %109 = vector.broadcast %cst_30 : f32 to vector<1x1x4xf32>
    %110 = arith.addf %109, %108 : vector<1x1x4xf32>
    %111 = arith.divf %109, %110 : vector<1x1x4xf32>
    %c0_31 = arith.constant 0 : index
    %c0_32 = arith.constant 0 : index
    %c0_33 = arith.constant 0 : index
    %112 = vector.load %arg3[%c0_31, %c0_32, %c0_33] : memref<1x1x4xf32, #tpu.memory_space<vmem>>, vector<1x1x4xf32>
    tpu.vector_store %arg3[%c0_31, %c0_32, %c0_33], %111 {strides = array<i32>} : memref<1x1x4xf32, #tpu.memory_space<vmem>>, vector<1x1x4xf32>,
    return
  }
  func.func @transform_0(%arg0: i32) -> (i32, i32, i32) {
    %c0_i32 = arith.constant 0 : i32
    %c0_i32_0 = arith.constant 0 : i32
    %c0_i32_1 = arith.constant 0 : i32
    return %arg0, %c0_i32, %c0_i32_0 : i32, i32, i32
  }
  func.func @transform_1(%arg0: i32) -> (i32, i32) {
    %c0_i32 = arith.constant 0 : i32
    %c0_i32_0 = arith.constant 0 : i32
    %c0_i32_1 = arith.constant 0 : i32
    return %c0_i32, %c0_i32_0 : i32, i32
  }
  func.func @transform_2(%arg0: i32) -> (i32, i32, i32) {
    %c0_i32 = arith.constant 0 : i32
    %c0_i32_0 = arith.constant 0 : i32
    %c0_i32_1 = arith.constant 0 : i32
    return %arg0, %c0_i32, %c0_i32_0 : i32, i32, i32
  }
}

</mosaic_0001>

<bundles_post_ra>
// kernel: variable_cnn1d_forward.1
= control target key start
LH: loop header
LB: loop body
LE: loop exit
PB: predicated region body
PF: predicated region fallthrough
CT: control target
= control target key end

     0   :  { %s2847_s9 = smov 0   ;;  %s3089_s0 = inlined_call_operand.vmem [shape: f32[8,16,4], index: 0, kind: input, shape index: {}]   ;;  %s3090_s1 = inlined_call_operand.vmem [shape: f32[45,16], index: 1, kind: input, shape index: {}]   ;;  %s3091_s2 = inlined_call_operand.vmem [shape: f32[2,1,4], index: 2, kind: output, shape index: {}]  }
   0x1 LB: > { %s2853_s10 = sadd.s32 4294967295, %s2829_s9   ;;  %p2499_p0 = scmp.ge.s32.totalorder %s2829_s9, 1  ;;  %s2829_s9 = sphi %s2847_s9, %s12_s9  }
   0x2   : > { %p114_p1 = scmp.lt.s32.totalorder %s2829_s9, 3 }
   0x4   : > { %p115_p2 = pnand %p2499_p0, %p114_p1 }
   0x5   : > { %v154_v0 = vld [vmem:[%s3090_s1 + $0x4] sm:$0xf] (!%p115_p2)  ;;  %vm166_vm0 = vcmask (!%p115_p2), 1043456   ;;  %s2500_s13 = sshll.u32 (!%p115_p2), %s2853_s10, 2  ;;  %vm157_vm1 = vcmask (!%p115_p2), 1046528   ;;  %vm161_vm2 = vcmask (!%p115_p2), 31744  }
   0x6   : > { %118 = sbr.rel (%p115_p2) target bundleno = 831 (0x33f), region = 28  ;;  %2644 = vmatprep.subr.msk.mxu0 (!%p115_p2), %vm166_vm0, %v154_v0  ;;  %2649 = vmatprep.subr.msk.mxu1 (!%p115_p2), %vm166_vm0, %v154_v0  ;;  %p136_p3 = scmp.lt.s32.totalorder (!%p115_p2), %s2500_s13, 7  ;;  %v153_v21 = vld [vmem:[%s3090_s1] sm:$0xf] (!%p115_p2)  ;;  %v816_v24 = vld [vmem:[%s3090_s1 + $0x8] sm:$0xf] (!%p115_p2) }
   0x7   : > { %2645 = vmatpush3.msk.msra.mxu0 (!%p115_p2), %vm166_vm0, %v154_v0  ;;  %2650 = vmatpush3.msk.msra.mxu1 (!%p115_p2), %vm166_vm0, %v154_v0  ;;  %vm817_vm3 = vcmask (!%p115_p2), 1045504   ;;  %v2949_v35 = vld [vmem:[%s3090_s1 + $0x15] sm:$0xff] (!%p115_p2)  ;;  %v2354_v36 = vld [vmem:[%s3090_s1 + $0x2c] sm:$0x1] (!%p115_p2)  ;;  %v2831_v37 = vmov (!%p115_p2), 0   ;;  %vm1185_vm4 = vcmask (!%p115_p2), 64512  }
   0x8   : > { %2654 = vmatprep.subr.msk.mxu0 (!%p115_p2), %vm166_vm0, %v154_v0  ;;  %2659 = vmatprep.subr.msk.mxu1 (!%p115_p2), %vm166_vm0, %v154_v0  ;;  %v2539_v38 = vld [vmem:[%s3090_s1 + $0xc] ss:$0 sm:$0xff] (!%p115_p2)  ;;  %vm2337_vm5 = vcmask (!%p115_p2), 122880   ;;  %vm2428_vm6 = vcmask (!%p115_p2), 1041409   ;;  %vm2431_vm7 = vcmask (!%p115_p2), 1042434   ;;  %vm2434_vm8 = vcmask (!%p115_p2), 1043459  }
   0x9   : > { %2805 = vset.pattern.permute.xlu0 (!%p115_p2), %v2831_v37  ;;  %2806 = vset.pattern.permute.xlu1 (!%p115_p2), %v2831_v37  ;;  %v2216_v37 = vld [vmem:[%s3090_s1 + $0x27] sm:$0x1] (!%p115_p2)  ;;  %p142_p4 = scmp.lt.s32.totalorder (!%p115_p2), %s2853_s10, 1  ;;  %vm2446_vm9 = vcmask (!%p115_p2), 24576  }
   0xa   : > { %2357 = vperm.xlu0 (!%p115_p2), %2805, %v2354_v36  }
   0xd   : > { %s3093_s13 = smov (!%p136_p3, %s2500_s13), 7  ;;  %s3095_s10 = smov (!%p142_p4, %s2853_s10), 1 }
   0xe   : > { %s2571_s14 = sshll.u32 %s3093_s13, 4  ;;  %s144_s22 = scalar_lea.vmem %s3091_s2, %s3095_s10 }
   0xf   : > { %s140_s17 = scalar_lea.vmem %s3089_s0, %s2571_s14 }
  0x10   : > { %v145_v1 = vld [vmem:[%s140_s17] sm:$0xff]  ;;  %v2870_v2 = vld [vmem:[%s140_s17 + $0x8] sm:$0xff]  ;;  %v147_v3 = vld [vmem:[%s140_s17 + $0x10] sm:$0xff] }
  0x11   : > { %v158_v4 = vrot.slane %v145_v1, 1  ;;  %v159_v5 = vrot.slane %v2870_v2, 1  ;;  %v2873_v6 = vld [vmem:[%s140_s17 + $0x18] sm:$0xff]  ;;  %v247_v7 = vrot.slane %v147_v3, 1  ;;  %v149_v8 = vld [vmem:[%s140_s17 + $0x20] sm:$0xff]  ;;  %v2875_v9 = vld [vmem:[%s140_s17 + $0x28] sm:$0xff] }
  0x12   : > { %v248_v10 = vrot.slane %v2873_v6, 1  ;;  %v331_v11 = vrot.slane %v149_v8, 1  ;;  %v332_v12 = vrot.slane %v2875_v9, 1  ;;  %v151_v13 = vld [vmem:[%s140_s17 + $0x30] sm:$0xff]  ;;  %v2879_v14 = vld [vmem:[%s140_s17 + $0x38] sm:$0xff]  ;;  %v818_v22 = vrot.slane %v145_v1, 2 }
  0x13   : > { %v160_v15 = vsel %vm157_vm1, %v158_v4, %v159_v5  ;;  %v415_v16 = vrot.slane %v151_v13, 1  ;;  %v416_v17 = vrot.slane %v2879_v14, 1  ;;  %v819_v23 = vrot.slane %v2870_v2, 2 }
  0x14   : > { %2646 = vmatprep.mubr.msk.f32.mxu0 %vm161_vm2, %v160_v15  ;;  %v249_v18 = vsel %vm157_vm1, %v247_v7, %v248_v10  ;;  %v333_v19 = vsel %vm157_vm1, %v331_v11, %v332_v12  ;;  %v903_v25 = vrot.slane %v147_v3, 2  ;;  %v904_v26 = vrot.slane %v2873_v6, 2 }
  0x15   : > { %2651 = vmatprep.mubr.msk.f32.mxu1 %vm161_vm2, %v249_v18  ;;  %2647 = vmatmul.mubr.msk.f32.vlgmr.msra.gmra.mrb[0].mxu0 %vm161_vm2, %v159_v5  ;;  %v417_v20 = vsel %vm157_vm1, %v415_v16, %v416_v17  ;;  %v820_v27 = vsel %vm817_vm3, %v818_v22, %v819_v23  ;;  %v985_v28 = vrot.slane %v149_v8, 2  ;;  %v986_v29 = vrot.slane %v2875_v9, 2 }
  0x16   : > { %2652 = vmatmul.mubr.msk.f32.vlgmr.msra.gmra.mrb[0].mxu1 %vm161_vm2, %v248_v10  ;;  %2655 = vmatpush3.msk.msra.mxu0 %vm166_vm0, %v154_v0  ;;  %v905_v30 = vsel %vm817_vm3, %v903_v25, %v904_v26  ;;  %v1067_v31 = vrot.slane %v151_v13, 2  ;;  %v1068_v32 = vrot.slane %v2879_v14, 2  ;;  %v2359_v25 = vlaneseq }
  0x17   : > { %2656 = vmatprep.mubr.msk.f32.mxu0 %vm161_vm2, %v333_v19  ;;  %2660 = vmatpush3.msk.msra.mxu1 %vm166_vm0, %v154_v0  ;;  %v987_v33 = vsel %vm817_vm3, %v985_v28, %v986_v29 }
  0x18   : > { %2661 = vmatprep.mubr.msk.f32.mxu1 %vm161_vm2, %v417_v20  ;;  %2664 = vmatprep.subr.msk.mxu0 %vm166_vm0, %v153_v21  ;;  %v1069_v34 = vsel %vm817_vm3, %v1067_v31, %v1068_v32 }
  0x19   : > { %2657 = vmatmul.mubr.msk.f32.vlgmr.msra.gmra.mrb[2].mxu0 %vm161_vm2, %v332_v12  ;;  %2669 = vmatprep.subr.msk.mxu1 %vm166_vm0, %v153_v21 }
  0x1a   : > { %2662 = vmatmul.mubr.msk.f32.vlgmr.msra.gmra.mrb[2].mxu1 %vm161_vm2, %v416_v17  ;;  %2665 = vmatpush3.msk.msra.mxu0 %vm166_vm0, %v153_v21 }
  0x1b   : > { %2666 = vmatprep.mubr.msk.f32.mxu0 %vm161_vm2, %v145_v1  ;;  %2670 = vmatpush3.msk.msra.mxu1 %vm166_vm0, %v153_v21 }
  0x1c   : > { %2671 = vmatprep.mubr.msk.f32.mxu1 %vm161_vm2, %v147_v3  ;;  %2674 = vmatprep.subr.msk.mxu0 %vm166_vm0, %v153_v21 }
  0x1d   : > { %2667 = vmatmul.mubr.msk.f32.vlgmr.msra.gmra.mrb[0].mxu0 %vm161_vm2, %v2870_v2  ;;  %2679 = vmatprep.subr.msk.mxu1 %vm166_vm0, %v153_v21 }
  0x1e   : > { %2672 = vmatmul.mubr.msk.f32.vlgmr.msra.gmra.mrb[0].mxu1 %vm161_vm2, %v2873_v6  ;;  %2675 = vmatpush3.msk.msra.mxu0 %vm166_vm0, %v153_v21 }
  0x1f   : > { %2676 = vmatprep.mubr.msk.f32.mxu0 %vm161_vm2, %v149_v8  ;;  %2680 = vmatpush3.msk.msra.mxu1 %vm166_vm0, %v153_v21 }
  0x20   : > { %2681 = vmatprep.mubr.msk.f32.mxu1 %vm161_vm2, %v151_v13  ;;  %2684 = vmatprep.subr.msk.mxu0 %vm166_vm0, %v816_v24 }
  0x21   : > { %2677 = vmatmul.mubr.msk.f32.vlgmr.msra.gmra.mrb[2].mxu0 %vm161_vm2, %v2875_v9  ;;  %2689 = vmatprep.subr.msk.mxu1 %vm166_vm0, %v816_v24  ;;  %v1178_v9 = vld [vmem:[%s3090_s1 + $0xd] sm:$0xff] }
  0x22   : > { %2682 = vmatmul.mubr.msk.f32.vlgmr.msra.gmra.mrb[2].mxu1 %vm161_vm2, %v2879_v14  ;;  %2685 = vmatpush3.msk.msra.mxu0 %vm166_vm0, %v816_v24 }
  0x23   : > { %2686 = vmatprep.mubr.msk.f32.mxu0 %vm161_vm2, %v820_v27  ;;  %2690 = vmatpush3.msk.msra.mxu1 %vm166_vm0, %v816_v24 }
  0x24   : > { %2691 = vmatprep.mubr.msk.f32.mxu1 %vm161_vm2, %v905_v30  ;;  %2694 = vmatprep.subr.msk.mxu0 %vm166_vm0, %v816_v24 }
  0x25   : > { %2687 = vmatmul.mubr.msk.f32.vlgmr.msra.gmra.mrb[0].mxu0 %vm161_vm2, %v819_v23  ;;  %2699 = vmatprep.subr.msk.mxu1 %vm166_vm0, %v816_v24 }
  0x26   : > { %2692 = vmatmul.mubr.msk.f32.vlgmr.msra.gmra.mrb[0].mxu1 %vm161_vm2, %v904_v26  ;;  %2695 = vmatpush3.msk.msra.mxu0 %vm166_vm0, %v816_v24  ;;  %v3022_v26 = vshrl.u32 %v2359_v25, 7 }
  0x27   : > { %2696 = vmatprep.mubr.msk.f32.mxu0 %vm161_vm2, %v987_v33  ;;  %2700 = vmatpush3.msk.msra.mxu1 %vm166_vm0, %v816_v24  ;;  %v1833_v24 = vld [vmem:[%s3090_s1 + $0x1d] sm:$0xff] }
  0x28   : > { %2701 = vmatprep.mubr.msk.f32.mxu1 %vm161_vm2, %v1069_v34  ;;  %2704 = vmatprep.subr.mxu0 %v2949_v35  ;;  %v2361_v27 = vsub.s32 0, %v3022_v26  ;;  %v2372_v28 = vsub.s32 1, %v3022_v26  ;;  %v2379_v31 = vsub.s32 2, %v3022_v26  ;;  %v2564_v34 = vld [vmem:[%s3090_s1 + $0x25] ss:$0 sm:$0xff] }
  0x29   : > { %2697 = vmatmul.mubr.msk.f32.vlgmr.msra.gmra.mrb[2].mxu0 %vm161_vm2, %v986_v29  ;;  %2709 = vmatprep.subr.mxu1 %v2949_v35 }
  0x2a   : > { %2702 = vmatmul.mubr.msk.f32.vlgmr.msra.gmra.mrb[2].mxu1 %vm161_vm2, %v1068_v32  ;;  %2705 = vmatpush3.msra.mxu0 %v2949_v35 }
  0x2b   : > { %2710 = vmatpush3.msra.mxu1 %v2949_v35  ;;  %2714 = vmatprep.subr.mxu0 %v2949_v35 }
  0x2c   : > { %2719 = vmatprep.subr.mxu1 %v2949_v35 }
  0x89   : > { %v2358_v29 = vpop.permute.xlu0 %2357 }
  0x8a   : > { %v3038_v30 = vrot.slane %v2358_v29, %v2361_v27 }
  0x8c   : > { %v2373_v32 = vrot.slane %v3038_v30, %v2372_v28  ;;  %v2380_v33 = vrot.slane %v3038_v30, %v2379_v31 }
  0x8e   : > { %2375 = vbcast.lane.b32.xlu1 %v2373_v32, 256 }
  0x92   : > { %2382 = vbcast.lane.b32.xlu1 %v2380_v33, 256 }
  0xf8   : > { %v2688_v39 = vpop.f32.mrb[0].mxu0 }
  0xf9   : > { %v1163_v40 = vadd.f32 %v2688_v39, %v2539_v38  ;;  %v2693_v41 = vpop.f32.mrb[0].mxu1  ;;  %v894_v42 = vpop.f32.mrb[1].mxu0 }
  0xfa   : > { %v1165_v43 = vadd.f32 %v2693_v41, %v2539_v38  ;;  %v1162_v44 = vadd.f32 %v2539_v38, %v894_v42  ;;  %v976_v45 = vpop.f32.mrb[1].mxu1 }
  0xfb   : > { %v2963_v46 = vmax.f32 %v1163_v40, 0.0  ;;  %v1164_v47 = vadd.f32 %v2539_v38, %v976_v45 }
  0xfc   : > { %v2965_v48 = vmax.f32 %v1165_v43, 0.0  ;;  %v1170_v49 = vmax.f32 %v1162_v44, 0.0  ;;  %v2698_v50 = vpop.f32.mrb[2].mxu0 }
  0xfd   : > { %v1183_v51 = vrot.slane %v2963_v46, 1  ;;  %v1835_v52 = vrot.slane %v2963_v46, 2  ;;  %v1172_v53 = vmax.f32 %v1164_v47, 0.0  ;;  %v1167_v54 = vadd.f32 %v2698_v50, %v2539_v38  ;;  %v2703_v55 = vpop.f32.mrb[2].mxu1  ;;  %v1058_v56 = vpop.f32.mrb[3].mxu0 }
  0xfe   : > { %v1268_v57 = vrot.slane %v2965_v48, 1  ;;  %v1917_v58 = vrot.slane %v2965_v48, 2  ;;  %v1182_v59 = vrot.slane %v1170_v49, 1  ;;  %v1834_v60 = vrot.slane %v1170_v49, 2  ;;  %v1140_v61 = vpop.f32.mrb[3].mxu1 }
  0xff   : > { %v1267_v62 = vrot.slane %v1172_v53, 1  ;;  %v1916_v63 = vrot.slane %v1172_v53, 2  ;;  %v2971_v0 = vmax.f32 %v1167_v54, 0.0  ;;  %v1169_v1 = vadd.f32 %v2703_v55, %v2539_v38  ;;  %v2240_v47 = vld [vmem:[%s3090_s1 + $0x28] sm:$0x1] }
 0x100   : > { %v1166_v2 = vadd.f32 %v2539_v38, %v1058_v56  ;;  %v1168_v3 = vadd.f32 %v2539_v38, %v1140_v61  ;;  %v1184_v4 = vsel %vm157_vm1, %v1182_v59, %v1183_v51  ;;  %v1836_v5 = vsel %vm817_vm3, %v1834_v60, %v1835_v52 }
 0x101   : > { %v1352_v6 = vrot.slane %v2971_v0, 1  ;;  %v2978_v7 = vmax.f32 %v1169_v1, 0.0  ;;  %2706 = vmatprep.mubr.msk.f32.mxu0 %vm1185_vm4, %v1184_v4  ;;  %v1269_v8 = vsel %vm157_vm1, %v1267_v62, %v1268_v57  ;;  %v1999_v10 = vrot.slane %v2971_v0, 2 }
 0x102   : > { %v1174_v11 = vmax.f32 %v1166_v2, 0.0  ;;  %v1176_v12 = vmax.f32 %v1168_v3, 0.0  ;;  %2711 = vmatprep.mubr.msk.f32.mxu1 %vm1185_vm4, %v1269_v8  ;;  %2707 = vmatmul.mubr.msk.f32.vlgmr.msra.gmra.mrb[4].mxu0 %vm1185_vm4, %v1183_v51  ;;  %v1918_v13 = vsel %vm817_vm3, %v1916_v63, %v1917_v58  ;;  %v2242_v1 = vrot.slane %v2240_v47, 4  ;;  %v2313_v3 = vld [vmem:[%s3090_s1 + $0x2b] sm:$0x1] }
 0x103   : > { %v1436_v14 = vrot.slane %v2978_v7, 1  ;;  %v2081_v15 = vrot.slane %v2978_v7, 2  ;;  %2712 = vmatmul.mubr.msk.f32.vlgmr.msra.gmra.mrb[4].mxu1 %vm1185_vm4, %v1268_v57  ;;  %2715 = vmatpush3.msra.mxu0 %v2949_v35 }
 0x104   : > { %v1351_v16 = vrot.slane %v1174_v11, 1  ;;  %v1998_v17 = vrot.slane %v1174_v11, 2  ;;  %v1435_v18 = vrot.slane %v1176_v12, 1  ;;  %v2080_v19 = vrot.slane %v1176_v12, 2  ;;  %2720 = vmatpush3.msra.mxu1 %v2949_v35  ;;  %2724 = vmatprep.subr.mxu0 %v1178_v9 }
 0x105   : > { %2729 = vmatprep.subr.mxu1 %v1178_v9 }
 0x106   : > { %v1353_v20 = vsel %vm157_vm1, %v1351_v16, %v1352_v6  ;;  %v1437_v21 = vsel %vm157_vm1, %v1435_v18, %v1436_v14  ;;  %v2000_v22 = vsel %vm817_vm3, %v1998_v17, %v1999_v10  ;;  %v2082_v23 = vsel %vm817_vm3, %v2080_v19, %v2081_v15 }
 0x107   : > { %2716 = vmatprep.mubr.msk.f32.mxu0 %vm1185_vm4, %v1353_v20  ;;  %2721 = vmatprep.mubr.msk.f32.mxu1 %vm1185_vm4, %v1437_v21 }
 0x108   : > { %2717 = vmatmul.mubr.msk.f32.vlgmr.msra.gmra.mrb[6].mxu0 %vm1185_vm4, %v1352_v6  ;;  %2722 = vmatmul.mubr.msk.f32.vlgmr.msra.gmra.mrb[6].mxu1 %vm1185_vm4, %v1436_v14 }
 0x109   : > { %2725 = vmatpush3.msra.mxu0 %v1178_v9  ;;  %2726 = vmatprep.mubr.msk.f32.mxu0 %vm1185_vm4, %v1170_v49 }
 0x10a   : > { %2731 = vmatprep.mubr.msk.f32.mxu1 %vm1185_vm4, %v1172_v53  ;;  %2730 = vmatpush3.msra.mxu1 %v1178_v9 }
 0x10b   : > { %2734 = vmatprep.subr.mxu0 %v1178_v9  ;;  %2739 = vmatprep.subr.mxu1 %v1178_v9 }
 0x10c   : > { %2727 = vmatmul.mubr.msk.f32.vlgmr.msra.gmra.mrb[4].mxu0 %vm1185_vm4, %v2963_v46  ;;  %2732 = vmatmul.mubr.msk.f32.vlgmr.msra.gmra.mrb[4].mxu1 %vm1185_vm4, %v2965_v48  ;;  %v2218_v46 = vrot.slane %v2216_v37, 6 }
 0x10d   : > { %2735 = vmatpush3.msra.mxu0 %v1178_v9  ;;  %2736 = vmatprep.mubr.msk.f32.mxu0 %vm1185_vm4, %v1174_v11  ;;  %v3064_v11 = vld [vmem:[%s3090_s1 + $0x2a] sm:$0x1] }
 0x10e   : > { %2741 = vmatprep.mubr.msk.f32.mxu1 %vm1185_vm4, %v1176_v12  ;;  %2740 = vmatpush3.msra.mxu1 %v1178_v9 }
 0x10f   : > { %2744 = vmatprep.subr.mxu0 %v1833_v24  ;;  %2749 = vmatprep.subr.mxu1 %v1833_v24 }
 0x110   : > { %2737 = vmatmul.mubr.msk.f32.vlgmr.msra.gmra.mrb[6].mxu0 %vm1185_vm4, %v2971_v0  ;;  %2742 = vmatmul.mubr.msk.f32.vlgmr.msra.gmra.mrb[6].mxu1 %vm1185_vm4, %v2978_v7 }
 0x111   : > { %2745 = vmatpush3.msra.mxu0 %v1833_v24  ;;  %2746 = vmatprep.mubr.msk.f32.mxu0 %vm1185_vm4, %v1836_v5  ;;  %v2207_v5 = vld [vmem:[%s3090_s1 + $0x26] sm:$0x1] }
 0x112   : > { %2751 = vmatprep.mubr.msk.f32.mxu1 %vm1185_vm4, %v1918_v13  ;;  %2750 = vmatpush3.msra.mxu1 %v1833_v24 }
 0x113   : > { %2754 = vmatprep.subr.mxu0 %v1833_v24  ;;  %2759 = vmatprep.subr.mxu1 %v1833_v24 }
 0x114   : > { %2747 = vmatmul.mubr.msk.f32.vlgmr.msra.gmra.mrb[4].mxu0 %vm1185_vm4, %v1835_v52  ;;  %2752 = vmatmul.mubr.msk.f32.vlgmr.msra.gmra.mrb[4].mxu1 %vm1185_vm4, %v1917_v58  ;;  %v2264_v52 = vld [vmem:[%s3090_s1 + $0x29] sm:$0x1] }
 0x115   : > { %2755 = vmatpush3.msra.mxu0 %v1833_v24  ;;  %2756 = vmatprep.mubr.msk.f32.mxu0 %vm1185_vm4, %v2000_v22  ;;  %v2266_v2 = vrot.slane %v2264_v52, 2 }
 0x116   : > { %2761 = vmatprep.mubr.msk.f32.mxu1 %vm1185_vm4, %v2082_v23  ;;  %2760 = vmatpush3.msra.mxu1 %v1833_v24 }
 0x118   : > { %2757 = vmatmul.mubr.msk.f32.vlgmr.msra.gmra.mrb[6].mxu0 %vm1185_vm4, %v1999_v10  ;;  %2762 = vmatmul.mubr.msk.f32.vlgmr.msra.gmra.mrb[6].mxu1 %vm1185_vm4, %v2081_v15  ;;  %v2315_v15 = vrot.slane %v2313_v3, 6 }
 0x1e7   : > { %v2748_v35 = vpop.f32.mrb[4].mxu0  ;;  %v2753_v36 = vpop.f32.mrb[4].mxu1 }
 0x1e8   : > { %v2176_v38 = vadd.f32 %v2748_v35, %v2564_v34  ;;  %v2178_v39 = vadd.f32 %v2753_v36, %v2564_v34  ;;  %v1907_v40 = vpop.f32.mrb[5].mxu0  ;;  %v1989_v41 = vpop.f32.mrb[5].mxu1 }
 0x1e9   : > { %v2175_v42 = vadd.f32 %v2564_v34, %v1907_v40  ;;  %v2177_v43 = vadd.f32 %v2564_v34, %v1989_v41 }
 0x1ea   : > { %v2184_v44 = vmax.f32 %v2176_v38, 0.0  ;;  %v2186_v45 = vmax.f32 %v2178_v39, 0.0 }
 0x1eb   : > { %v2183_v48 = vmax.f32 %v2175_v42, 0.0  ;;  %v2185_v49 = vmax.f32 %v2177_v43, 0.0  ;;  %v2758_v50 = vpop.f32.mrb[6].mxu0  ;;  %v2763_v51 = vpop.f32.mrb[6].mxu1 }
 0x1ec   : > { %v2292_v53 = vrot.slane %v2184_v44, 1  ;;  %v2293_v54 = vrot.slane %v2186_v45, 1  ;;  %v2180_v55 = vadd.f32 %v2758_v50, %v2564_v34  ;;  %v2182_v56 = vadd.f32 %v2763_v51, %v2564_v34  ;;  %v2071_v57 = vpop.f32.mrb[7].mxu0  ;;  %v2153_v58 = vpop.f32.mrb[7].mxu1 }
 0x1ed   : > { %v2195_v59 = vrot.slane %v2183_v48, 1  ;;  %v2196_v60 = vrot.slane %v2185_v49, 1  ;;  %v2179_v61 = vadd.f32 %v2564_v34, %v2071_v57  ;;  %v2181_v62 = vadd.f32 %v2564_v34, %v2153_v58 }
 0x1ee   : > { %v2188_v63 = vmax.f32 %v2180_v55, 0.0  ;;  %v2190_v0 = vmax.f32 %v2182_v56, 0.0  ;;  %v2300_v9 = vmax.f32 %v2184_v44, %v2292_v53  ;;  %v2301_v10 = vmax.f32 %v2186_v45, %v2293_v54 }
 0x1ef   : > { %v2203_v4 = vmax.f32 %v2183_v48, %v2195_v59  ;;  %v2204_v6 = vmax.f32 %v2185_v49, %v2196_v60  ;;  %v2187_v7 = vmax.f32 %v2179_v61, 0.0  ;;  %v2189_v8 = vmax.f32 %v2181_v62, 0.0 }
 0x1f0   : > { %v2294_v14 = vrot.slane %v2188_v63, 1  ;;  %v2295_v17 = vrot.slane %v2190_v0, 1  ;;  %v2305_v24 = vmul.f32 %v3064_v11, %v2300_v9  ;;  %v2306_v28 = vmul.f32 %v3064_v11, %v2301_v10 }
 0x1f1   : > { %v2220_v12 = vmul.f32 %v2218_v46, %v2203_v4  ;;  %v2221_v13 = vmul.f32 %v2218_v46, %v2204_v6  ;;  %v2209_v16 = vmul.f32 %v2207_v5, %v2204_v6  ;;  %v2197_v18 = vrot.slane %v2187_v7, 1 }
 0x1f2   : > { %v2198_v19 = vrot.slane %v2189_v8, 1  ;;  %v2245_v22 = vmul.f32 %v2242_v1, %v2204_v6  ;;  %v2269_v23 = vmul.f32 %v2266_v2, %v2204_v6  ;;  %v2208_v32 = vmul.f32 %v2207_v5, %v2203_v4 }
 0x1f3   : > { %v2228_v20 = vrot.slane %v2220_v12, 2  ;;  %v2229_v21 = vrot.slane %v2221_v13, 2  ;;  %v2205_v29 = vmax.f32 %v2187_v7, %v2197_v18  ;;  %v2302_v33 = vmax.f32 %v2188_v63, %v2294_v14 }
 0x1f4   : > { %v2206_v31 = vmax.f32 %v2189_v8, %v2198_v19  ;;  %v2253_v35 = vrot.slane %v2245_v22, 4  ;;  %v2303_v36 = vmax.f32 %v2190_v0, %v2295_v17  ;;  %v2318_v39 = vmul.f32 %v2315_v15, %v2301_v10 }
 0x1f5   : > { %v2237_v34 = vadd.f32 %v2229_v21, %v2209_v16  ;;  %v2222_v37 = vmul.f32 %v2218_v46, %v2205_v29  ;;  %v2277_v41 = vrot.slane %v2269_v23, 6  ;;  %v2236_v42 = vadd.f32 %v2228_v20, %v2208_v32  ;;  %v2376_v32 = vpop.permute.xlu1 %2375 }
 0x1f6   : > { %v2223_v38 = vmul.f32 %v2218_v46, %v2206_v31  ;;  %v2244_v43 = vmul.f32 %v2242_v1, %v2203_v4  ;;  %v2210_v44 = vmul.f32 %v2207_v5, %v2205_v29  ;;  %v2268_v48 = vmul.f32 %v2266_v2, %v2203_v4 }
 0x1f7   : > { %v2261_v40 = vadd.f32 %v2253_v35, %v2237_v34  ;;  %v2230_v45 = vrot.slane %v2222_v37, 2  ;;  %v2246_v51 = vmul.f32 %v2242_v1, %v2205_v29  ;;  %v2270_v52 = vmul.f32 %v2266_v2, %v2205_v29 }
 0x1f8   : > { %v2231_v47 = vrot.slane %v2223_v38, 2  ;;  %v2252_v50 = vrot.slane %v2244_v43, 4  ;;  %v2211_v53 = vmul.f32 %v2207_v5, %v2206_v31  ;;  %v2326_v54 = vrot.slane %v2318_v39, 2 }
 0x1f9   : > { %v2285_v49 = vadd.f32 %v2277_v41, %v2261_v40  ;;  %v2317_v55 = vmul.f32 %v2315_v15, %v2300_v9  ;;  %v2238_v56 = vadd.f32 %v2230_v45, %v2210_v44  ;;  %v2276_v46 = vrot.slane %v2268_v48, 6 }
 0x1fa   : > { %v2260_v58 = vadd.f32 %v2252_v50, %v2236_v42  ;;  %v2254_v59 = vrot.slane %v2246_v51, 4  ;;  %v2319_v60 = vmul.f32 %v2315_v15, %v2302_v33  ;;  %v2239_v61 = vadd.f32 %v2231_v47, %v2211_v53 }
 0x1fb   : > { %v2310_v57 = vadd.f32 %v2306_v28, %v2285_v49  ;;  %v2247_v62 = vmul.f32 %v2242_v1, %v2206_v31  ;;  %v2271_v63 = vmul.f32 %v2266_v2, %v2206_v31  ;;  %v2278_v4 = vrot.slane %v2270_v52, 6 }
 0x1fc   : > { %v2284_v3 = vadd.f32 %v2276_v46, %v2260_v58  ;;  %v2262_v6 = vadd.f32 %v2254_v59, %v2238_v56  ;;  %v2307_v7 = vmul.f32 %v3064_v11, %v2302_v33  ;;  %v2325_v9 = vrot.slane %v2317_v55, 2  ;;  %v2383_v33 = vpop.permute.xlu1 %2382 }
 0x1fd   : > { %v2334_v0 = vadd.f32 %v2326_v54, %v2310_v57  ;;  %v2255_v8 = vrot.slane %v2247_v62, 4  ;;  %v2279_v14 = vrot.slane %v2271_v63, 6  ;;  %v2320_v16 = vmul.f32 %v2315_v15, %v2303_v36 }
 0x1fe   : > { %v2309_v10 = vadd.f32 %v2305_v24, %v2284_v3  ;;  %v2286_v12 = vadd.f32 %v2278_v4, %v2262_v6  ;;  %v2327_v1 = vrot.slane %v2319_v60, 2  ;;  %v2308_v2 = vmul.f32 %v3064_v11, %v2303_v36 }
 0x1ff   : > { %v2341_v5 = vsel %vm2337_vm5, %v2334_v0, 0.0  ;;  %v2263_v13 = vadd.f32 %v2255_v8, %v2239_v61  ;;  %v2328_v23 = vrot.slane %v2320_v16, 2  ;;  %v2386_v15 = vsub.s32 3, %v3022_v26 }
 0x200   : > { %2342 = vadd.xlane.f32.xlu0 %v2341_v5  ;;  %v2333_v17 = vadd.f32 %v2325_v9, %v2309_v10  ;;  %v2311_v18 = vadd.f32 %v2307_v7, %v2286_v12  ;;  %v2366_v11 = vrot.slane %v3038_v30, %v2361_v27  ;;  %v2440_v0 = vand.u32 127, %v2359_v25 }
 0x201   : > { %v2287_v19 = vadd.f32 %v2279_v14, %v2263_v13  ;;  %v2387_v31 = vrot.slane %v3038_v30, %v2386_v15 }
 0x202   : > { %v2338_v20 = vsel %vm2337_vm5, %v2333_v17, 0.0  ;;  %v2335_v21 = vadd.f32 %v2327_v1, %v2311_v18  ;;  %v2443_v3 = vsub.s32 %v2440_v0, %v3022_v26 }
 0x203   : > { %2339 = vadd.xlane.f32.xlu1 %v2338_v20  ;;  %v2312_v22 = vadd.f32 %v2308_v2, %v2287_v19 }
 0x204   : > { %v2344_v24 = vsel %vm2337_vm5, %v2335_v21, 0.0 }
 0x205   : > { %v2336_v28 = vadd.f32 %v2328_v23, %v2312_v22 }
 0x207   : > { %2345 = vadd.xlane.f32.xlu1 %v2344_v24  ;;  %v2347_v29 = vsel %vm2337_vm5, %v2336_v28, 0.0 }
 0x20b   : > { %2348 = vadd.xlane.f32.xlu1 %v2347_v29 }
 0x216   : > { %2389 = vbcast.lane.b32.xlu0 %v2387_v31, 256 }
 0x21c   : > { %2368 = vbcast.lane.b32.xlu1 %v2366_v11, 256 }
 0x28d   : > { %v2343_v34 = vpop.xlane.xlu0 %2342 }
 0x28e   : > { %v2396_v36 = vadd.f32 %v2376_v32, %v2343_v34 }
 0x290   : > { %v2340_v35 = vpop.xlane.xlu1 %2339  ;;  %v2566_v38 = vmul.f32 -1.442695, %v2396_v36 }
 0x291   : > { %v2390_v41 = vpop.permute.xlu0 %2389 }
 0x292   : > { %2807 = vpow2.f32 %v2566_v38 }
 0x294   : > { %v2346_v37 = vpop.xlane.xlu1 %2345 }
 0x295   : > { %v2397_v39 = vadd.f32 %v2383_v33, %v2346_v37 }
 0x297   : > { %v2567_v40 = vmul.f32 -1.442695, %v2397_v39 }
 0x298   : > { %v2349_v42 = vpop.xlane.xlu1 %2348 }
 0x299   : > { %v2398_v43 = vadd.f32 %v2390_v41, %v2349_v42  ;;  %2809 = vpow2.f32 %v2567_v40 }
 0x29b   : > { %v2568_v44 = vmul.f32 -1.442695, %v2398_v43 }
 0x29c   : > { %v2369_v45 = vpop.permute.xlu1 %2368  ;;  %v2808_v30 = vpop.eup %2807 }
 0x29d   : > { %2811 = vpow2.f32 %v2568_v44  ;;  %v2395_v47 = vadd.f32 %v2369_v45, %v2340_v35  ;;  %v2412_v49 = vadd.f32 1.0, %v2808_v30 }
 0x29f   : > { %v2565_v27 = vmul.f32 -1.442695, %v2395_v47 }
 0x2a1   : > { %2813 = vpow2.f32 %v2565_v27 }
 0x2a2   : > { %2815 = vrcp.f32 %v2412_v49 }
 0x2a3   : > { %v2810_v48 = vpop.eup %2809 }
 0x2a4   : > { %v2413_v51 = vadd.f32 1.0, %v2810_v48 }
 0x2a6   : > { %2817 = vrcp.f32 %v2413_v51 }
 0x2a7   : > { %v2812_v50 = vpop.eup %2811 }
 0x2a8   : > { %v2414_v52 = vadd.f32 1.0, %v2812_v50 }
 0x2aa   : > { %2819 = vrcp.f32 %v2414_v52 }
 0x2ab   : > { %v2814_v53 = vpop.eup %2813 }
 0x2ac   : > { %v2411_v54 = vadd.f32 1.0, %v2814_v53  ;;  %v2816_v55 = vpop.eup %2815 }
 0x2ad   : > { %v2427_v58 = vrot.slane %v2816_v55, 7 }
 0x2ae   : > { %2821 = vrcp.f32 %v2411_v54 }
 0x2b0   : > { %v2818_v56 = vpop.eup %2817 }
 0x2b1   : > { %v2430_v59 = vrot.slane %v2818_v56, 6 }
 0x2b4   : > { %v2820_v57 = vpop.eup %2819 }
 0x2b5   : > { %v2433_v61 = vrot.slane %v2820_v57, 5 }
 0x2b8   : > { %v2822_v46 = vpop.eup %2821 }
 0x2b9   : > { %v2429_v60 = vsel %vm2428_vm6, %v2427_v58, %v2822_v46 }
 0x2ba   : > { %v2432_v62 = vsel %vm2431_vm7, %v2430_v59, %v2429_v60 }
 0x2bb   : > { %v2435_v63 = vsel %vm2434_vm8, %v2433_v61, %v2432_v62 }
 0x2bc   : > { %2437 = vperm.xlu1 %2806, %v2435_v63  }
 0x33b   : > { %v2438_v6 = vpop.permute.xlu1 %2437 }
 0x33c   : > { %v2444_v4 = vrot.slane %v2438_v6, %v2443_v3 }
 0x33e   : > { %2447 = vst.msk [vmem:[%s144_s22] sm:$0x1] %vm2446_vm9, %v2444_v4 }
 0x33f PF: > { %s12_s9 = sadd.s32 1, %s2829_s9  }
 0x340   : > { %p9_p5 = scmp.ge.s32.totalorder %s12_s9, 4  }
 0x342   :  { %11 = sbr.rel (!%p9_p5) target bundleno = 1 (0x1), region = 58 }

</bundles_post_ra>
